<compile_context>
chip_gen: v6e
topology: v6e:2x2x1
jax: 0.10.0
libtpu: 0.0.40
codegen_flags: <defaults>
</compile_context>

<pallas_src>
import math

import jax
import jax.numpy as jnp
from jax.experimental import pallas as pl
from jax.experimental.pallas import tpu as pltpu


# ------------------------------- kernel -------------------------------------
def captionnet_kernel(x_ref, text_ref, h0_ref, c0_ref,
                      wi_ref, wh_ref, wt_ref, b_ref,
                      out_ref, h_s, c_s):
    t = pl.program_id(0)
    B, H = h0_ref.shape

    # Load the initial recurrent state into VMEM scratch on the first step.
    @pl.when(t == 0)
    def _():
        h_s[...] = h0_ref[...]
        c_s[...] = c0_ref[...]

    x = x_ref[0]        # [B, Din]   (per-step block)
    text = text_ref[0]  # [B, H]     (per-step block)

    # i2h(x) + h2h(h) + fused bias  -> [B, 4H], f32 accumulation on the MXU.
    pre = (jnp.dot(x, wi_ref[...], preferred_element_type=jnp.float32)
           + jnp.dot(h_s[...], wh_ref[...], preferred_element_type=jnp.float32)
           + b_ref[...])
    # t2h(text) only feeds the [o|f] half -> its own small dot (no zero pad).
    t_of = jnp.dot(text, wt_ref[...], preferred_element_type=jnp.float32)  # [B, 2H]

    i_t = jax.nn.sigmoid(pre[:, 0:H])
    g_t = jnp.tanh(pre[:, H:2 * H])
    of = jax.nn.sigmoid(pre[:, 2 * H:4 * H] + t_of)
    o_t = of[:, 0:H]
    f_t = of[:, H:2 * H]

    c_new = g_t * i_t + c_s[...] * f_t
    h_new = jnp.tanh(c_new) * o_t

    # Carry the recurrent state in scratch.
    h_s[...] = h_new
    c_s[...] = c_new

    # Single packed output slab per step: [h | c | broadcast(sum(f_t))].
    # TODO(synk): the scalar could instead go to an SMEM output; kept in the
    # VMEM slab to guarantee clean lowering.
    out_ref[0, :, 0:H] = h_new
    out_ref[0, :, H:2 * H] = c_new
    out_ref[0, :, 2 * H:3 * H] = jnp.broadcast_to(
        jnp.sum(f_t, keepdims=True), (B, H))


# ------------------------------- wrapper ------------------------------------
@jax.jit
def captionnet_forward_seq(xs, texts, h0, c0, wi, wh, wt, b_all):
    """Run T cell steps in one pallas_call.

    xs: [T, B, Din], texts: [T, B, H], h0/c0: [B, H]
    wi: [Din, 4H], wh: [H, 4H], wt: [H, 2H], b_all: [1, 4H]
    returns: h_all [T, B, H], c_all [T, B, H], ft_all [T]
    """
    T, B, Din = xs.shape
    H = h0.shape[1]

    out = pl.pallas_call(
        captionnet_kernel,
        out_shape=jax.ShapeDtypeStruct((T, B, 3 * H), jnp.float32),
        grid_spec=pltpu.PrefetchScalarGridSpec(
            num_scalar_prefetch=0,
            grid=(T,),
            in_specs=[
                pl.BlockSpec((1, B, Din), lambda t: (t, 0, 0)),   # x_t
                pl.BlockSpec((1, B, H), lambda t: (t, 0, 0)),     # text_t
                pl.BlockSpec((B, H), lambda t: (0, 0)),           # h0 (resident)
                pl.BlockSpec((B, H), lambda t: (0, 0)),           # c0 (resident)
                pl.BlockSpec((Din, 4 * H), lambda t: (0, 0)),     # i2h_w (resident)
                pl.BlockSpec((H, 4 * H), lambda t: (0, 0)),       # h2h_w (resident)
                pl.BlockSpec((H, 2 * H), lambda t: (0, 0)),       # t2h_w (resident)
                pl.BlockSpec((1, 4 * H), lambda t: (0, 0)),       # fused bias
            ],
            out_specs=pl.BlockSpec((1, B, 3 * H), lambda t: (t, 0, 0)),
            scratch_shapes=[
                pltpu.VMEM((B, H), jnp.float32),   # h carry
                pltpu.VMEM((B, H), jnp.float32),   # c carry
            ],
        ),
        compiler_params=pltpu.CompilerParams(
            dimension_semantics=("arbitrary",)),   # recurrence: sequential
    )(xs, texts, h0, c0, wi, wh, wt, b_all)

    h_all = out[:, :, 0:H]
    c_all = out[:, :, H:2 * H]
    ft_all = out[:, 0, 2 * H]          # sum(f_t) per step
    return h_all, c_all, ft_all


def captionnet_step(x, text, h, c, wi, wh, wt, b_all):
    """Single cell step (matches CaptionNet.forward): T=1 sequence."""
    h_all, c_all, ft_all = captionnet_forward_seq(
        x[None], text[None], h, c, wi, wh, wt, b_all)
    return h_all[0], c_all[0], ft_all[0]


# ------------------------------ params --------------------------------------
def init_params(key, *, input_size, hidden_size):
    """Mimics CaptionNet.reset_parameters(): uniform(-1/sqrt(H), 1/sqrt(H))."""
    H = hidden_size
    std = 1.0 / math.sqrt(H)
    ks = jax.random.split(key, 6)

    def u(k, shape):
        return jax.random.uniform(k, shape, jnp.float32, -std, std)

    # Weights stored as [in, out] (transposed vs. PyTorch's [out, in]).
    return {
        "i2h_w": u(ks[0], (input_size, 4 * H)), "i2h_b": u(ks[1], (1, 4 * H)),
        "h2h_w": u(ks[2], (H, 4 * H)),          "h2h_b": u(ks[3], (1, 4 * H)),
        "t2h_w": u(ks[4], (H, 2 * H)),          "t2h_b": u(ks[5], (1, 2 * H)),
    }


def prepare_params(p):
    """Hoisted out of the per-step path: fold the three biases once."""
    H = p["h2h_w"].shape[0]
    b_all = p["i2h_b"] + p["h2h_b"]
    b_all = b_all.at[:, 2 * H:].add(p["t2h_b"])
    return p["i2h_w"], p["h2h_w"], p["t2h_w"], b_all


# ------------------------ pure-JAX reference check ---------------------------
def captionnet_reference_step(x, text, h, c, p):
    H = h.shape[1]
    i_g = x @ p["i2h_w"] + p["i2h_b"] + h @ p["h2h_w"] + p["h2h_b"]
    i_t = jax.nn.sigmoid(i_g[:, :H])
    g_t = jnp.tanh(i_g[:, H:2 * H])
    o_f = jax.nn.sigmoid(i_g[:, 2 * H:] + text @ p["t2h_w"] + p["t2h_b"])
    o_t, f_t = o_f[:, :H], o_f[:, H:]
    c_t = g_t * i_t + c * f_t
    h_t = jnp.tanh(c_t) * o_t
    return h_t, c_t, jnp.sum(f_t)


if __name__ == "__main__":
    B, Din, H, T = 2, 64, 32, 8

    key = jax.random.PRNGKey(0)
    kp, kx, kt, kh, kc = jax.random.split(key, 5)

    params = init_params(kp, input_size=Din, hidden_size=H)
    xs = jax.random.normal(kx, (T, B, Din), jnp.float32)
    texts = jax.random.normal(kt, (T, B, H), jnp.float32)
    h0 = jax.random.normal(kh, (B, H), jnp.float32)
    c0 = jax.random.normal(kc, (B, H), jnp.float32)

    # Fuse biases ONCE (outside the per-call / per-step path).
    wi, wh, wt, b_all = prepare_params(params)

    # --- full T-step rollout in a single pallas_call ---
    h_all, c_all, ft_all = captionnet_forward_seq(xs, texts, h0, c0,
                                                  wi, wh, wt, b_all)
    jax.block_until_ready((h_all, c_all, ft_all))

    # --- reference rollout (pure JAX, step by step) ---
    h_r, c_r = h0, c0
    hs_r, cs_r, fts_r = [], [], []
    for s in range(T):
        h_r, c_r, f_r = captionnet_reference_step(xs[s], texts[s], h_r, c_r, params)
        hs_r.append(h_r)
        cs_r.append(c_r)
        fts_r.append(f_r)
    hs_r = jnp.stack(hs_r)
    cs_r = jnp.stack(cs_r)
    fts_r = jnp.stack(fts_r)

    assert h_all.shape == (T, B, H) and c_all.shape == (T, B, H)
    assert ft_all.shape == (T,)
    assert h_all.dtype == jnp.float32 and c_all.dtype == jnp.float32
    assert jnp.allclose(h_all, hs_r, atol=1e-4, rtol=1e-4)
    assert jnp.allclose(c_all, cs_r, atol=1e-4, rtol=1e-4)
    assert jnp.allclose(ft_all, fts_r, atol=1e-3, rtol=1e-4)

    # --- single-step API (exactly the PyTorch module's forward) ---
    h1, c1, f1 = captionnet_step(xs[0], texts[0], h0, c0, wi, wh, wt, b_all)
    jax.block_until_ready((h1, c1, f1))
    assert jnp.allclose(h1, hs_r[0], atol=1e-4, rtol=1e-4)
    assert jnp.allclose(c1, cs_r[0], atol=1e-4, rtol=1e-4)
    assert jnp.allclose(f1, fts_r[0], atol=1e-3, rtol=1e-4)

    print("KERNEL_OK")
</pallas_src>

<mosaic_0001>
module attributes {stable_mosaic.version = 11 : i64} {
  func.func @captionnet_kernel(%arg0: i32, %arg1: memref<1x2x64xf32, #tpu.memory_space<vmem>>, %arg2: memref<1x2x32xf32, #tpu.memory_space<vmem>>, %arg3: memref<2x32xf32, #tpu.memory_space<vmem>>, %arg4: memref<2x32xf32, #tpu.memory_space<vmem>>, %arg5: memref<64x128xf32, #tpu.memory_space<vmem>>, %arg6: memref<32x128xf32, #tpu.memory_space<vmem>>, %arg7: memref<32x64xf32, #tpu.memory_space<vmem>>, %arg8: memref<1x128xf32, #tpu.memory_space<vmem>>, %arg9: memref<1x2x96xf32, #tpu.memory_space<vmem>>, %arg10: memref<2x32xf32, #tpu.memory_space<vmem>>, %arg11: memref<2x32xf32, #tpu.memory_space<vmem>>) attributes {dimension_semantics = [#tpu.dimension_semantics<arbitrary>], iteration_bounds = array<i64: 8>, scalar_prefetch = 0 : i64, scratch_operands = 2 : i64, tpu.core_type = #tpu.core_type<tc>, window_params = [{transform_indices = @transform_0, window_bounds = array<i64: 1, 2, 64>}, {transform_indices = @transform_1, window_bounds = array<i64: 1, 2, 32>}, {pipeline_mode = #tpu.pipeline_mode<synchronous>, transform_indices = @transform_2, window_bounds = array<i64: 2, 32>}, {pipeline_mode = #tpu.pipeline_mode<synchronous>, transform_indices = @transform_3, window_bounds = array<i64: 2, 32>}, {pipeline_mode = #tpu.pipeline_mode<synchronous>, transform_indices = @transform_4, window_bounds = array<i64: 64, 128>}, {pipeline_mode = #tpu.pipeline_mode<synchronous>, transform_indices = @transform_5, window_bounds = array<i64: 32, 128>}, {pipeline_mode = #tpu.pipeline_mode<synchronous>, transform_indices = @transform_6, window_bounds = array<i64: 32, 64>}, {pipeline_mode = #tpu.pipeline_mode<synchronous>, transform_indices = @transform_7, window_bounds = array<i64: 1, 128>}, {transform_indices = @transform_8, window_bounds = array<i64: 1, 2, 96>}]} {
    %c0_i32 = arith.constant 0 : i32
    %0 = arith.cmpi eq, %arg0, %c0_i32 : i32
    %1 = arith.extui %0 : i1 to i32
    %c0_i32_0 = arith.constant 0 : i32
    %2 = arith.cmpi ne, %1, %c0_i32_0 : i32
    scf.if %2 {
      %c0_34 = arith.constant 0 : index
      %c0_35 = arith.constant 0 : index
      %59 = vector.load %arg3[%c0_34, %c0_35] : memref<2x32xf32, #tpu.memory_space<vmem>>, vector<2x32xf32>
      %c0_36 = arith.constant 0 : index
      %c0_37 = arith.constant 0 : index
      %60 = vector.load %arg10[%c0_36, %c0_37] : memref<2x32xf32, #tpu.memory_space<vmem>>, vector<2x32xf32>
      tpu.vector_store %arg10[%c0_36, %c0_37], %59 {strides = array<i32>} : memref<2x32xf32, #tpu.memory_space<vmem>>, vector<2x32xf32>,
      %c0_38 = arith.constant 0 : index
      %c0_39 = arith.constant 0 : index
      %61 = vector.load %arg4[%c0_38, %c0_39] : memref<2x32xf32, #tpu.memory_space<vmem>>, vector<2x32xf32>
      %c0_40 = arith.constant 0 : index
      %c0_41 = arith.constant 0 : index
      %62 = vector.load %arg11[%c0_40, %c0_41] : memref<2x32xf32, #tpu.memory_space<vmem>>, vector<2x32xf32>
      tpu.vector_store %arg11[%c0_40, %c0_41], %61 {strides = array<i32>} : memref<2x32xf32, #tpu.memory_space<vmem>>, vector<2x32xf32>,
    } else {
    }
    %c0 = arith.constant 0 : index
    %c0_1 = arith.constant 0 : index
    %c0_2 = arith.constant 0 : index
    %3 = vector.load %arg1[%c0, %c0_1, %c0_2] : memref<1x2x64xf32, #tpu.memory_space<vmem>>, vector<1x2x64xf32>
    %4 = vector.shape_cast %3 : vector<1x2x64xf32> to vector<2x64xf32>
    %c0_3 = arith.constant 0 : index
    %c0_4 = arith.constant 0 : index
    %c0_5 = arith.constant 0 : index
    %5 = vector.load %arg2[%c0_3, %c0_4, %c0_5] : memref<1x2x32xf32, #tpu.memory_space<vmem>>, vector<1x2x32xf32>
    %6 = vector.shape_cast %5 : vector<1x2x32xf32> to vector<2x32xf32>
    %c0_6 = arith.constant 0 : index
    %c0_7 = arith.constant 0 : index
    %7 = vector.load %arg5[%c0_6, %c0_7] : memref<64x128xf32, #tpu.memory_space<vmem>>, vector<64x128xf32>
    %cst = arith.constant dense<0.000000e+00> : vector<2x128xf32>
    %8 = tpu.matmul %4, %7, %cst {dimension_numbers = #tpu.dot_dimension_numbers<[1], [0], [0], [1], [0, 0, 1, 1], [], []>} : vector<2x64xf32>, vector<64x128xf32>, vector<2x128xf32> -> vector<2x128xf32>
    %c0_8 = arith.constant 0 : index
    %c0_9 = arith.constant 0 : index
    %9 = vector.load %arg10[%c0_8, %c0_9] : memref<2x32xf32, #tpu.memory_space<vmem>>, vector<2x32xf32>
    %c0_10 = arith.constant 0 : index
    %c0_11 = arith.constant 0 : index
    %10 = vector.load %arg6[%c0_10, %c0_11] : memref<32x128xf32, #tpu.memory_space<vmem>>, vector<32x128xf32>
    %cst_12 = arith.constant dense<0.000000e+00> : vector<2x128xf32>
    %11 = tpu.matmul %9, %10, %cst_12 {dimension_numbers = #tpu.dot_dimension_numbers<[1], [0], [0], [1], [0, 0, 1, 1], [], []>} : vector<2x32xf32>, vector<32x128xf32>, vector<2x128xf32> -> vector<2x128xf32>
    %12 = arith.addf %8, %11 : vector<2x128xf32>
    %c0_13 = arith.constant 0 : index
    %c0_14 = arith.constant 0 : index
    %13 = vector.load %arg8[%c0_13, %c0_14] : memref<1x128xf32, #tpu.memory_space<vmem>>, vector<1x128xf32>
    %14 = vector.broadcast %13 : vector<1x128xf32> to vector<2x128xf32>
    %15 = arith.addf %12, %14 : vector<2x128xf32>
    %c0_15 = arith.constant 0 : index
    %c0_16 = arith.constant 0 : index
    %16 = vector.load %arg7[%c0_15, %c0_16] : memref<32x64xf32, #tpu.memory_space<vmem>>, vector<32x64xf32>
    %cst_17 = arith.constant dense<0.000000e+00> : vector<2x64xf32>
    %17 = tpu.matmul %6, %16, %cst_17 {dimension_numbers = #tpu.dot_dimension_numbers<[1], [0], [0], [1], [0, 0, 1, 1], [], []>} : vector<2x32xf32>, vector<32x64xf32>, vector<2x64xf32> -> vector<2x64xf32>
    %18 = vector.extract_strided_slice %15 {offsets = [0, 0], sizes = [2, 32], strides = [1, 1]} : vector<2x128xf32> to vector<2x32xf32>
    %19 = arith.negf %18 : vector<2x32xf32>
    %20 = math.exp %19 : vector<2x32xf32>
    %cst_18 = arith.constant 1.000000e+00 : f32
    %21 = vector.broadcast %cst_18 : f32 to vector<2x32xf32>
    %22 = arith.addf %21, %20 : vector<2x32xf32>
    %23 = arith.divf %21, %22 : vector<2x32xf32>
    %24 = vector.extract_strided_slice %15 {offsets = [0, 32], sizes = [2, 32], strides = [1, 1]} : vector<2x128xf32> to vector<2x32xf32>
    %25 = math.tanh %24 : vector<2x32xf32>
    %26 = vector.extract_strided_slice %15 {offsets = [0, 64], sizes = [2, 64], strides = [1, 1]} : vector<2x128xf32> to vector<2x64xf32>
    %27 = arith.addf %26, %17 : vector<2x64xf32>
    %28 = arith.negf %27 : vector<2x64xf32>
    %29 = math.exp %28 : vector<2x64xf32>
    %cst_19 = arith.constant 1.000000e+00 : f32
    %30 = vector.broadcast %cst_19 : f32 to vector<2x64xf32>
    %31 = arith.addf %30, %29 : vector<2x64xf32>
    %32 = arith.divf %30, %31 : vector<2x64xf32>
    %33 = vector.extract_strided_slice %32 {offsets = [0, 0], sizes = [2, 32], strides = [1, 1]} : vector<2x64xf32> to vector<2x32xf32>
    %34 = vector.extract_strided_slice %32 {offsets = [0, 32], sizes = [2, 32], strides = [1, 1]} : vector<2x64xf32> to vector<2x32xf32>
    %35 = arith.mulf %25, %23 : vector<2x32xf32>
    %c0_20 = arith.constant 0 : index
    %c0_21 = arith.constant 0 : index
    %36 = vector.load %arg11[%c0_20, %c0_21] : memref<2x32xf32, #tpu.memory_space<vmem>>, vector<2x32xf32>
    %37 = arith.mulf %36, %34 : vector<2x32xf32>
    %38 = arith.addf %35, %37 : vector<2x32xf32>
    %39 = math.tanh %38 : vector<2x32xf32>
    %40 = arith.mulf %39, %33 : vector<2x32xf32>
    %c0_22 = arith.constant 0 : index
    %c0_23 = arith.constant 0 : index
    %41 = vector.load %arg10[%c0_22, %c0_23] : memref<2x32xf32, #tpu.memory_space<vmem>>, vector<2x32xf32>
    tpu.vector_store %arg10[%c0_22, %c0_23], %40 {strides = array<i32>} : memref<2x32xf32, #tpu.memory_space<vmem>>, vector<2x32xf32>,
    %c0_24 = arith.constant 0 : index
    %c0_25 = arith.constant 0 : index
    %42 = vector.load %arg11[%c0_24, %c0_25] : memref<2x32xf32, #tpu.memory_space<vmem>>, vector<2x32xf32>
    tpu.vector_store %arg11[%c0_24, %c0_25], %38 {strides = array<i32>} : memref<2x32xf32, #tpu.memory_space<vmem>>, vector<2x32xf32>,
    %c0_26 = arith.constant 0 : index
    %c0_27 = arith.constant 0 : index
    %c0_28 = arith.constant 0 : index
    %43 = vector.load %arg9[%c0_26, %c0_27, %c0_28] : memref<1x2x96xf32, #tpu.memory_space<vmem>>, vector<1x2x32xf32>
    %44 = vector.shape_cast %43 : vector<1x2x32xf32> to vector<2x32xf32>
    %45 = vector.shape_cast %40 : vector<2x32xf32> to vector<1x2x32xf32>
    tpu.vector_store %arg9[%c0_26, %c0_27, %c0_28], %45 {strides = array<i32>} : memref<1x2x96xf32, #tpu.memory_space<vmem>>, vector<1x2x32xf32>,
    %c0_29 = arith.constant 0 : index
    %c0_30 = arith.constant 0 : index
    %c32 = arith.constant 32 : index
    %46 = vector.load %arg9[%c0_29, %c0_30, %c32] : memref<1x2x96xf32, #tpu.memory_space<vmem>>, vector<1x2x32xf32>
    %47 = vector.shape_cast %46 : vector<1x2x32xf32> to vector<2x32xf32>
    %48 = vector.shape_cast %38 : vector<2x32xf32> to vector<1x2x32xf32>
    tpu.vector_store %arg9[%c0_29, %c0_30, %c32], %48 {strides = array<i32>} : memref<1x2x96xf32, #tpu.memory_space<vmem>>, vector<1x2x32xf32>,
    %49 = vector.shape_cast %34 : vector<2x32xf32> to vector<1x2x32xf32>
    %cst_31 = arith.constant dense<0.000000e+00> : vector<1xf32>
    %50 = vector.multi_reduction <add>, %49, %cst_31 [1, 2] : vector<1x2x32xf32> to vector<1xf32>
    %51 = vector.shape_cast %50 : vector<1xf32> to vector<1x1x1xf32>
    %52 = vector.extract %51[0, 0, 0] : f32 from vector<1x1x1xf32>
    %53 = vector.broadcast %52 : f32 to vector<1x1xf32>
    %54 = vector.shape_cast %53 : vector<1x1xf32> to vector<1x1xf32>
    %55 = vector.broadcast %54 : vector<1x1xf32> to vector<2x32xf32>
    %c0_32 = arith.constant 0 : index
    %c0_33 = arith.constant 0 : index
    %c64 = arith.constant 64 : index
    %56 = vector.load %arg9[%c0_32, %c0_33, %c64] : memref<1x2x96xf32, #tpu.memory_space<vmem>>, vector<1x2x32xf32>
    %57 = vector.shape_cast %56 : vector<1x2x32xf32> to vector<2x32xf32>
    %58 = vector.shape_cast %55 : vector<2x32xf32> to vector<1x2x32xf32>
    tpu.vector_store %arg9[%c0_32, %c0_33, %c64], %58 {strides = array<i32>} : memref<1x2x96xf32, #tpu.memory_space<vmem>>, vector<1x2x32xf32>,
    return
  }
  func.func @transform_0(%arg0: i32) -> (i32, i32, i32) {
    %c0_i32 = arith.constant 0 : i32
    %c0_i32_0 = arith.constant 0 : i32
    %c0_i32_1 = arith.constant 0 : i32
    return %arg0, %c0_i32, %c0_i32_0 : i32, i32, i32
  }
  func.func @transform_1(%arg0: i32) -> (i32, i32, i32) {
    %c0_i32 = arith.constant 0 : i32
    %c0_i32_0 = arith.constant 0 : i32
    %c0_i32_1 = arith.constant 0 : i32
    return %arg0, %c0_i32, %c0_i32_0 : i32, i32, i32
  }
  func.func @transform_2(%arg0: i32) -> (i32, i32) {
    %c0_i32 = arith.constant 0 : i32
    %c0_i32_0 = arith.constant 0 : i32
    %c0_i32_1 = arith.constant 0 : i32
    return %c0_i32, %c0_i32_0 : i32, i32
  }
  func.func @transform_3(%arg0: i32) -> (i32, i32) {
    %c0_i32 = arith.constant 0 : i32
    %c0_i32_0 = arith.constant 0 : i32
    %c0_i32_1 = arith.constant 0 : i32
    return %c0_i32, %c0_i32_0 : i32, i32
  }
  func.func @transform_4(%arg0: i32) -> (i32, i32) {
    %c0_i32 = arith.constant 0 : i32
    %c0_i32_0 = arith.constant 0 : i32
    %c0_i32_1 = arith.constant 0 : i32
    return %c0_i32, %c0_i32_0 : i32, i32
  }
  func.func @transform_5(%arg0: i32) -> (i32, i32) {
    %c0_i32 = arith.constant 0 : i32
    %c0_i32_0 = arith.constant 0 : i32
    %c0_i32_1 = arith.constant 0 : i32
    return %c0_i32, %c0_i32_0 : i32, i32
  }
  func.func @transform_6(%arg0: i32) -> (i32, i32) {
    %c0_i32 = arith.constant 0 : i32
    %c0_i32_0 = arith.constant 0 : i32
    %c0_i32_1 = arith.constant 0 : i32
    return %c0_i32, %c0_i32_0 : i32, i32
  }
  func.func @transform_7(%arg0: i32) -> (i32, i32) {
    %c0_i32 = arith.constant 0 : i32
    %c0_i32_0 = arith.constant 0 : i32
    %c0_i32_1 = arith.constant 0 : i32
    return %c0_i32, %c0_i32_0 : i32, i32
  }
  func.func @transform_8(%arg0: i32) -> (i32, i32, i32) {
    %c0_i32 = arith.constant 0 : i32
    %c0_i32_0 = arith.constant 0 : i32
    %c0_i32_1 = arith.constant 0 : i32
    return %arg0, %c0_i32, %c0_i32_0 : i32, i32, i32
  }
}

</mosaic_0001>

<bundles_post_ra>
// kernel: captionnet_forward_seq.1
= control target key start
LH: loop header
LB: loop body
LE: loop exit
PB: predicated region body
PF: predicated region fallthrough
CT: control target
= control target key end

     0   :  { %s1482_s0 = inlined_call_operand.hbm [shape: f32[8,2,64], index: 0, kind: input, shape index: {}]   ;;  %s1483_s1 = inlined_call_operand.hbm [shape: f32[8,2,32], index: 1, kind: input, shape index: {}]   ;;  %s1484_s2 = inlined_call_operand.vmem [shape: f32[2,32], index: 2, kind: input, shape index: {}]   ;;  %s1485_s3 = inlined_call_operand.vmem [shape: f32[2,32], index: 3, kind: input, shape index: {}]   ;;  %s1486_s4 = inlined_call_operand.hbm [shape: f32[64,128], index: 4, kind: input, shape index: {}]   ;;  %s1487_s5 = inlined_call_operand.hbm [shape: f32[32,128], index: 5, kind: input, shape index: {}]   ;;  %s1488_s6 = inlined_call_operand.hbm [shape: f32[32,64], index: 6, kind: input, shape index: {}]   ;;  %s1489_s7 = inlined_call_operand.vmem [shape: f32[1,128], index: 7, kind: input, shape index: {}]   ;;  %s1490_s8 = inlined_call_operand.vmem [shape: f32[8,2,96], index: 8, kind: output, shape index: {}]  }
   0x1   :  { %1494 = sst [smem:[#allocation16_spill]] %s1486_s4 }
   0x2   :  { %1495 = sst [smem:[#allocation17_spill]] %s1487_s5 }
   0x3   :  { %13 = vsyncpa [#allocation5], 0 }
   0x4   :  { %15 = vsyncpa [#allocation5 + $0x1], 0 }
   0x5   :  { %16 = vsyncpa [#allocation7], 0 }
   0x6   :  { %18 = vsyncpa [#allocation7 + $0x1], 0 }
   0x7   :  { %19 = vsyncpa [#allocation10], 0  ;;  %s1261_s27 = smov 0   ;;  %s1263_s28 = smov 0  }
   0x8   :  { %s1265_s29 = smov 0   ;;  %s1267_s30 = smov 0  }
   0x9 LB: > { %s1280_s9 = sadd.s32 4294967295, %s1202_s30   ;;  %p45_p0 = scmp.ne.s32.totalorder %s1194_s28, %s1190_s27  ;;  %s1202_s30 = sphi %s1267_s30, %s1512_s30   ;;  %s1198_s29 = sphi %s1265_s29, %s1511_s29   ;;  %s1194_s28 = sphi %s1263_s28, %s1510_s28   ;;  %s1190_s27 = sphi %s1261_s27, %s1509_s27  }
   0xa   : > { %p1491_p1 = scmp.eq.s32.totalorder %s1280_s9, 0  ;;  %p841_p2 = scmp.ge.s32.totalorder %s1202_s30, 1 }
   0xb   : > { %p234_p3 = scmp.lt.s32.totalorder %s1202_s30, 9  ;;  %s1204_s12 = smov [#allocation8]  }
   0xc   : > { %p1289_p5 = por %p1491_p1, %p45_p0  ;;  %s252_s13 = sshll.u32 %s1204_s12, 4  ;;  %s253_s13 = int_to_ptr.vmem [resolvable:$true] %s252_s13 }
   0xd   : > { %p1293_p6 = pnand %p841_p2, %p234_p3  ;;  %s1205_s15 = smov [#allocation9]  }
   0xe   : > { %s1496_s10 = scalar_select %p1289_p5, 1, 0 }
   0xf   : > { %s1497_s11 = scalar_select %p1293_p6, 1, 0 }
  0x10   : > { %p944_p7 = pneg %p1293_p6  ;;  %s265_s16 = sshll.u32 %s1205_s15, 4  ;;  %s266_s16 = int_to_ptr.vmem [resolvable:$true] %s265_s16 }
  0x11   : > { %s1206_s17 = smov [#allocation11]   ;;  %s1033_s19 = scalar_lea.vmem %s253_s13, 1024 }
  0x12   : > { %p1301_p8 = pnand %p944_p7, %p1491_p1  ;;  %s278_s18 = sshll.u32 %s1206_s17, 4  ;;  %s279_s18 = int_to_ptr.vmem [resolvable:$true] %s278_s18 }
  0x13   : > { %p1034_p10 = scmp.ne.s32.totalorder %s253_s13, %s1033_s19  ;;  %p1041_p13 = scmp.lt.s32.totalorder %s253_s13, %s253_s13 }
  0x14   : > { %p1024_p9 = pneg %p1301_p8  ;;  %p1042_p0 = scmp.lt.s32.totalorder %s1033_s19, %s1033_s19 }
  0x16   : > { %p1036_p11 = pnand %p1034_p10, %p1024_p9  ;;  %p1043_p2 = por %p1042_p0, %p1041_p13 }
  0x18   : > { %p1037_p12 = pneg %p1036_p11 }
  0x1a   : > { %p1044_p3 = pnand %p1043_p2, %p1037_p12 }
  0x1c   : > { %1047 = shalt.err (!%p1044_p3)
}
  0x1d   : > { %s1207_s20 = smov 128   ;;  %s1208_s21 = smov 8  }
  0x1e   : > { %s1499_s4 = sld [smem:[#allocation16_spill]]  ;;  %s1059_s24 = scalar_lea.vmem %s266_s16, 512 }
  0x1f   : > { %p1060_p7 = scmp.ne.s32.totalorder %s266_s16, %s1059_s24  ;;  %p1067_p4 = scmp.lt.s32.totalorder %s266_s16, %s266_s16 }
  0x20   : > { %p1068_p1 = scmp.lt.s32.totalorder %s1059_s24, %s1059_s24 }
  0x21   : > { %p1062_p10 = pnand %p1060_p7, %p1024_p9 }
  0x22   : > { %p1069_p13 = por %p1068_p1, %p1067_p4 }
  0x23   : > { %p1063_p11 = pneg %p1062_p10 }
  0x24   : > { %947 = dma.hbm_to_vmem [thread:$0]  (!%p1301_p8), %s1499_s4, 1024, %s253_s13, [#allocation7], %s1207_s20, %s1207_s20, %s1208_s21  }
  0x25   : > { %p1070_p12 = pnand %p1069_p13, %p1063_p11 }
  0x27   : > { %1073 = shalt.err (!%p1070_p12)
}
  0x28   : > { %s1500_s5 = sld [smem:[#allocation17_spill]]  ;;  %s1085_s27 = scalar_lea.vmem %s279_s18, 512 }
  0x29   : > { %p1086_p0 = scmp.ne.s32.totalorder %s279_s18, %s1085_s27  ;;  %p1093_p7 = scmp.lt.s32.totalorder %s279_s18, %s279_s18 }
  0x2a   : > { %p1094_p10 = scmp.lt.s32.totalorder %s1085_s27, %s1085_s27 }
  0x2b   : > { %p1088_p2 = pnand %p1086_p0, %p1024_p9 }
  0x2c   : > { %p1095_p5 = por %p1094_p10, %p1093_p7 }
  0x2d   : > { %p1089_p3 = pneg %p1088_p2 }
  0x2e   : > { %950 = dma.hbm_to_vmem [thread:$0]  (!%p1301_p8), %s1500_s5, 512, %s266_s16, [#allocation10], %s1207_s20, %s1207_s20, %s1208_s21  }
  0x2f   : > { %p1096_p1 = pnand %p1095_p5, %p1089_p3 }
  0x31   : > { %1099 = shalt.err (!%p1096_p1)
}
  0x32   : > { %953 = dma.hbm_to_vmem [thread:$0]  (!%p1301_p8), %s1488_s6, 512, %s279_s18, [#allocation10], %s1207_s20, %s1207_s20, %s1208_s21  }
  0x33   : > { %s1332_s15 = sadd.s32 1, %s1202_s30   ;;  %s32_s17 = sadd.s32 1, %s1198_s29 }
  0x34   : > { %s29_s16 = ssub.s32 %s1202_s30, %s1332_s15  ;;  %p39_p5 = scmp.ne.s32.totalorder %s1198_s29, %s1194_s28 }
  0x35   : > { %p30_p4 = scmp.eq.s32.totalorder %s29_s16, 0  ;;  %p40_p9 = scmp.eq.s32.totalorder %s1202_s30, 0 }
  0x36   : > { %p964_p11 = scmp.lt.s32.totalorder %s1202_s30, 8  ;;  %s295_s19 = sand.u32 1, %s1198_s29  }
  0x37   : > { %s1342_s14 = scalar_select %p30_p4, %s1198_s29, %s32_s17  }
  0x38   : > { %p41_p13 = por %p40_p9, %p39_p5  ;;  %s1345_s22 = sshll.u32 %s295_s19, 1 }
  0x39   : > { %s847_s23 = sshll.u32 %s1202_s30, 5  ;;  %s299_s21 = scalar_lea.vmem [#allocation4], %s1345_s22 }
  0x3a   : > { %s1351_s20 = scalar_lea.hbm %s1482_s0, %s847_s23  ;;  %s306_s25 = sshll.u32 %s299_s21, 4  ;;  %s1354_s25 = int_to_ptr.vmem [resolvable:$true] %s306_s25 }
  0x3b   : > { %p1356_p8 = pnand %p964_p11, %p41_p13  ;;  %s1363_s13 = scalar_lea.hbm %s1483_s1, %s847_s23 }
  0x3c   : > { %s313_s16 = sand.u32 1, %s1202_s30   ;;  %s296_s17 = scalar_lea.sflag [#allocation5], %s295_s19 }
  0x3d   : > { %s1100_s24 = scalar_lea.hbm %s1351_s20, 32  ;;  %p1102_p0 = pneg %p1356_p8 }
  0x3e   : > { %p1101_p12 = scmp.ne.s32.totalorder %s1351_s20, %s1100_s24  ;;  %s1105_s4 = scalar_lea.hbm %s1482_s0, 256 }
  0x3f   : > { %p1106_p7 = scmp.lt.s32.totalorder %s1351_s20, %s1482_s0  ;;  %p1107_p10 = scmp.lt.s32.totalorder %s1105_s4, %s1100_s24 }
  0x40   : > { %p1103_p2 = pnand %p1102_p0, %p1101_p12 }
  0x41   : > { %p1108_p1 = por %p1107_p10, %p1106_p7 }
  0x42   : > { %p1104_p3 = pneg %p1103_p2 }
  0x44   : > { %p1109_p4 = pnand %p1108_p1, %p1104_p3 }
  0x46   : > { %1112 = shalt.err (!%p1109_p4)
}
  0x47   : > { %s1113_s19 = scalar_lea.vmem %s1354_s25, 32  ;;  %s1209_s23 = smov [#allocation4]  }
  0x48   : > { %p1114_p5 = scmp.ne.s32.totalorder %s1354_s25, %s1113_s19  ;;  %s1118_s12 = sshll.u32 %s1209_s23, 4  ;;  %s1119_s12 = int_to_ptr.vmem [resolvable:$false] %s1118_s12 }
  0x49   : > { %s1120_s18 = scalar_lea.vmem %s1119_s12, 64  ;;  %p1121_p13 = scmp.lt.s32.totalorder %s1354_s25, %s1119_s12 }
  0x4a   : > { %p1116_p9 = pnand %p1114_p5, %p1102_p0  ;;  %p1122_p12 = scmp.lt.s32.totalorder %s1120_s18, %s1113_s19 }
  0x4c   : > { %p1117_p11 = pneg %p1116_p9  ;;  %p1123_p2 = por %p1122_p12, %p1121_p13 }
  0x4e   : > { %p1124_p7 = pnand %p1123_p2, %p1117_p11 }
  0x50   : > { %1127 = shalt.err (!%p1124_p7)
}
  0x51   : > { %957 = dma.hbm_to_vmem [thread:$0]  (!%p1356_p8), %s1351_s20, 32, %s1354_s25, %s296_s17  }
  0x52   : > { %s317_s4 = scalar_lea.vmem [#allocation6], %s1345_s22  ;;  %s314_s24 = scalar_lea.sflag [#allocation7], %s313_s16 }
  0x53   : > { %s324_s5 = sshll.u32 %s317_s4, 4  ;;  %s1128_s21 = scalar_lea.hbm %s1363_s13, 32  ;;  %s325_s5 = int_to_ptr.vmem [resolvable:$true] %s324_s5 }
  0x54   : > { %p1129_p3 = scmp.ne.s32.totalorder %s1363_s13, %s1128_s21  ;;  %s1133_s23 = scalar_lea.hbm %s1483_s1, 256 }
  0x55   : > { %p1134_p4 = scmp.lt.s32.totalorder %s1363_s13, %s1483_s1  ;;  %p1135_p5 = scmp.lt.s32.totalorder %s1133_s23, %s1128_s21 }
  0x56   : > { %p1131_p10 = pnand %p1129_p3, %p1102_p0 }
  0x57   : > { %p1136_p9 = por %p1135_p5, %p1134_p4 }
  0x58   : > { %p1132_p1 = pneg %p1131_p10 }
  0x5a   : > { %p1137_p11 = pnand %p1136_p9, %p1132_p1 }
  0x5c   : > { %1140 = shalt.err (!%p1137_p11)
}
  0x5d   : > { %s1141_s30 = scalar_lea.vmem %s325_s5, 32  ;;  %s1210_s22 = smov [#allocation6]  }
  0x5e   : > { %p1142_p13 = scmp.ne.s32.totalorder %s325_s5, %s1141_s30  ;;  %s1146_s20 = sshll.u32 %s1210_s22, 4  ;;  %s1147_s20 = int_to_ptr.vmem [resolvable:$false] %s1146_s20 }
  0x5f   : > { %s1148_s25 = scalar_lea.vmem %s1147_s20, 64  ;;  %p1149_p7 = scmp.lt.s32.totalorder %s325_s5, %s1147_s20 }
  0x60   : > { %p1144_p12 = pnand %p1142_p13, %p1102_p0  ;;  %p1150_p3 = scmp.lt.s32.totalorder %s1148_s25, %s1141_s30 }
  0x62   : > { %p1145_p2 = pneg %p1144_p12  ;;  %p1151_p10 = por %p1150_p3, %p1149_p7 }
  0x64   : > { %p1152_p6 = pnand %p1151_p10, %p1145_p2 }
  0x66   : > { %1155 = shalt.err (!%p1152_p6)
}
  0x67   : > { %960 = dma.hbm_to_vmem [thread:$0]  (!%p1356_p8), %s1363_s13, 32, %s325_s5, %s314_s24  }
  0x68   : > { %p1502_p1 = scmp.ne.s32.totalorder %s1497_s11, 0 }
  0x69   : > { %s335_s16 = sand.u32 (!%p1502_p1), 1, %s1194_s28   ;;  %p1503_p0 = scmp.ne.s32.totalorder (!%p1502_p1), %s1496_s10, 0 }
  0x6a   : > { %333 = sbr.rel (%p1502_p1) target bundleno = 863 (0x35f), region = 52  ;;  %s1414_s17 = sshll.u32 (!%p1502_p1), %s335_s16, 1 }
  0x6b   : > { %s336_s4 = scalar_lea.sflag (!%p1502_p1), [#allocation5], %s335_s16  ;;  %s339_s21 = scalar_lea.vmem (!%p1502_p1), [#allocation4], %s1414_s17 }
  0x6f   : > { %1173 = dma.done.wait (%p1503_p0), %s336_s4, 32  }
  0x70   : > { %1175 = vsyncadd (%p1503_p0), %s336_s4, 4294967264  ;;  %s344_s26 = sand.u32 1, %s1280_s9   ;;  %s348_s11 = scalar_lea.vmem [#allocation6], %s1414_s17 }
  0x71   : > { %s345_s13 = scalar_lea.sflag [#allocation7], %s344_s26 }
  0x72   : > { %1177 = dma.done.wait (%p1503_p0), %s345_s13, 32  }
  0x73   : > { %1179 = vsyncadd (%p1503_p0), %s345_s13, 4294967264  ;;  %p1504_p6 = scmp.eq.s32.totalorder %s1280_s9, 0 }
  0x75   : > { %1181 = dma.done.wait (%p1504_p6), [#allocation7], 1024   ;;  %p1505_p8 = pmov %p1504_p6 }
  0x76   : > { %p1506_p4 = pmov %p1504_p6 }
  0x77   : > { %1183 = vsyncadd (%p1505_p8), [#allocation7], 4294966272 }
  0x78   : > { %1185 = dma.done.wait (%p1506_p4), [#allocation10], 1024   ;;  %p1507_p5 = pmov %p1506_p4 }
  0x79   : > { %p397_p9 = scmp.lt.s32.totalorder %s1280_s9, 7  ;;  %p1508_p11 = scmp.ne.s32.totalorder %s1280_s9, 0 }
  0x7a   : > { %1187 = vsyncadd (%p1507_p5), [#allocation10], 4294966272 }
  0x7b   : > { %s398_s5 = scalar_select %p397_p9, %s1280_s9, 7 }
  0x7c   : > { %404 = sbr.rel (%p1508_p11) target bundleno = 132 (0x84), region = 76 }
  0x7d   : > { %s856_s24 = sshll.u32 %s398_s5, 1 }
  0x7e   : > { %s1440_s19 = scalar_lea.vmem %s1490_s8, %s856_s24 }
  0x81   : > { %v405_v0 = vld [vmem:[%s1484_s2] sm:$0x3]  ;;  %vm406_vm0 = vcmask 254976  }
  0x82   : > { %v408_v1 = vld [vmem:[%s1485_s3] sm:$0x3]  ;;  %407 = vst.msk [vmem:[#allocation2] sm:$0x3] %vm406_vm0, %v405_v0 }
  0x83   : > { %409 = vst.msk [vmem:[#allocation3] sm:$0x3] %vm406_vm0, %v408_v1 }
  0x84 PF: > { %v424_v2 = vld [vmem:[#allocation9 + $0x18] sm:$0xff]  ;;  %v1211_v4 = vmov 0.0   ;;  %v423_v5 = vld [vmem:[#allocation9 + $0x10] sm:$0xff]  ;;  %v422_v7 = vld [vmem:[#allocation9 + $0x8] sm:$0xff]  ;;  %vm425_vm1 = vcmask 261120   ;;  %vm1212_vm2 = vmmov 0  }
  0x85   : > { %v419_v3 = vld [vmem:[#allocation8 + $0x38] sm:$0xff]  ;;  %885 = vmatprep.subr.mxu0 %v1211_v4  ;;  %896 = vmatprep.subr.mxu1 %v1211_v4  ;;  %v418_v6 = vld [vmem:[#allocation8 + $0x30] sm:$0xff]  ;;  %v417_v8 = vld [vmem:[#allocation8 + $0x28] sm:$0xff]  ;;  %vm499_vm3 = vcmask 523264   ;;  %s1213_s20 = smov 64   ;;  %s1214_s25 = smov 32  }
  0x86   : > { %886 = vmatpush3.msra.mxu0 %v424_v2  ;;  %897 = vmatpush3.msra.mxu1 %v419_v3  ;;  %v421_v9 = vld [vmem:[#allocation9] sm:$0xff]  ;;  %v415_v12 = vld [vmem:[#allocation8 + $0x18] sm:$0xff]  ;;  %v414_v14 = vld [vmem:[#allocation8 + $0x10] sm:$0xff]  ;;  %vm701_vm4 = vcmask 254976   ;;  %s1215_s16 = smov 96   ;;  %vm709_vm5 = vcmask 517376  }
  0x87   : > { %887 = vmatprep.subr.mxu0 %v1211_v4  ;;  %898 = vmatprep.subr.mxu1 %v1211_v4  ;;  %v416_v10 = vld [vmem:[#allocation8 + $0x20] sm:$0xff]  ;;  %v584_v13 = vld [vmem:[#allocation11 + $0x18] sm:$0xff]  ;;  %v583_v15 = vld [vmem:[#allocation11 + $0x10] sm:$0xff]  ;;  %vm722_vm6 = vcmask 779776  }
  0x88   : > { %888 = vmatpush3.msra.mxu0 %v423_v5  ;;  %899 = vmatpush3.msra.mxu1 %v418_v6  ;;  %v413_v16 = vld [vmem:[#allocation8 + $0x8] sm:$0xff]  ;;  %v412_v18 = vld [vmem:[#allocation8] sm:$0xff]  ;;  %v410_v20 = vld [vmem:[%s339_s21] sm:$0x3] }
  0x89   : > { %889 = vmatprep.subr.mxu0 %v1211_v4  ;;  %900 = vmatprep.subr.mxu1 %v1211_v4  ;;  %v420_v11 = vld [vmem:[#allocation2] sm:$0x3]  ;;  %v582_v17 = vld [vmem:[#allocation11 + $0x8] sm:$0xff]  ;;  %v581_v19 = vld [vmem:[#allocation11] sm:$0xff] }
  0x8a   : > { %890 = vmatpush3.msra.mxu0 %v422_v7  ;;  %901 = vmatpush3.msra.mxu1 %v417_v8  ;;  %v411_v21 = vld [vmem:[%s348_s11] sm:$0x3]  ;;  %v860_v25 = vld [vmem:[%s1489_s7] ss:$0 sm:$0xff]  ;;  %v681_v41 = vld [vmem:[#allocation3] sm:$0x3] }
  0x8b   : > { %891 = vmatprep.subr.mxu0 %v1211_v4  ;;  %902 = vmatprep.subr.mxu1 %v1211_v4 }
  0x8c   : > { %892 = vmatpush3.msra.mxu0 %v421_v9  ;;  %893 = vmatprep.mubr.msk.f32.mxu0 %vm1212_vm2, %v1211_v4 }
  0x8d   : > { %903 = vmatpush3.msra.mxu1 %v416_v10  ;;  %894 = vmatmul.mubr.msk.f32.vlgmr.msra.gmra.mxu0 %vm425_vm1, %v420_v11 }
  0x8e   : > { %904 = vmatprep.subr.mxu1 %v1211_v4  ;;  %915 = vmatprep.subr.mxu0 %v1211_v4 }
  0x8f   : > { %905 = vmatpush3.msra.mxu1 %v415_v12  ;;  %916 = vmatpush3.msra.mxu0 %v584_v13 }
  0x90   : > { %906 = vmatprep.subr.mxu1 %v1211_v4  ;;  %917 = vmatprep.subr.mxu0 %v1211_v4 }
  0x91   : > { %907 = vmatpush3.msra.mxu1 %v414_v14  ;;  %918 = vmatpush3.msra.mxu0 %v583_v15 }
  0x92   : > { %908 = vmatprep.subr.mxu1 %v1211_v4  ;;  %919 = vmatprep.subr.mxu0 %v1211_v4 }
  0x93   : > { %909 = vmatpush3.msra.mxu1 %v413_v16  ;;  %920 = vmatpush3.msra.mxu0 %v582_v17 }
  0x94   : > { %910 = vmatprep.subr.mxu1 %v1211_v4  ;;  %921 = vmatprep.subr.mxu0 %v1211_v4 }
  0x95   : > { %911 = vmatpush3.msra.mxu1 %v412_v18  ;;  %912 = vmatprep.mubr.msk.f32.mxu1 %vm1212_vm2, %v1211_v4 }
  0x96   : > { %922 = vmatpush3.msra.mxu0 %v581_v19  ;;  %923 = vmatprep.mubr.msk.f32.mxu0 %vm1212_vm2, %v1211_v4 }
  0x97   : > { %913 = vmatmul.mubr.msk.f32.vlgmr.msra.gmra.mxu1 %vm499_vm3, %v410_v20  ;;  %924 = vmatmul.mubr.msk.f32.vlgmr.msra.gmra.mxu0 %vm425_vm1, %v411_v21 }
 0x14d   : > { %v495_v22 = vpop.f32.mrf.mxu0 }
 0x14f   : > { %v895_v23 = vpop.f32.mrf.mxu0 }
 0x157   : > { %v569_v24 = vpop.f32.mrf.mxu1  ;;  %v654_v26 = vpop.f32.mrf.mxu0 }
 0x158   : > { %v570_v27 = vadd.f32 %v569_v24, %v495_v22  ;;  %666 = vrot.lane.b32.xlu0 %v654_v26, %s1213_s20 }
 0x159   : > { %v925_v28 = vpop.f32.mrf.mxu0  ;;  %v914_v29 = vpop.f32.mrf.mxu1 }
 0x15a   : > { %v580_v30 = vadd.f32 %v860_v25, %v570_v27 }
 0x15c   : > { %v862_v31 = vmul.f32 -1.442695, %v580_v30 }
 0x15e   : > { %1010 = vpow2.f32 %v862_v31 }
 0x16b   : > { %v1011_v32 = vpop.eup %1010 }
 0x16c   : > { %v661_v33 = vadd.f32 1.0, %v1011_v32 }
 0x16e   : > { %1012 = vrcp.f32 %v661_v33 }
 0x17b   : > { %v1013_v34 = vpop.eup %1012 }
 0x17c   : > { %677 = vrot.lane.b32.xlu1 %v1013_v34, %s1214_s25 }
 0x1ca   : > { %v667_v35 = vpop.permute.xlu0 %666 }
 0x1cb   : > { %v669_v36 = vadd.f32 %v667_v35, %v580_v30 }
 0x1cd   : > { %v863_v37 = vmul.f32 -1.442695, %v669_v36 }
 0x1cf   : > { %1014 = vpow2.f32 %v863_v37 }
 0x1dc   : > { %v1015_v38 = vpop.eup %1014 }
 0x1dd   : > { %v673_v39 = vadd.f32 1.0, %v1015_v38 }
 0x1df   : > { %1016 = vrcp.f32 %v673_v39 }
 0x1e0   : > { %1018 = vtanh.f32 %v580_v30 }
 0x1ec   : > { %v1017_v40 = vpop.eup %1016 }
 0x1ed   : > { %683 = vrot.lane.b32.xlu0 %v1017_v40, %s1214_s25  ;;  %v1019_v46 = vpop.eup %1018 }
 0x1ee   : > { %v678_v45 = vpop.permute.xlu1 %677 }
 0x1ef   : > { %v680_v47 = vmul.f32 %v1019_v46, %v678_v45 }
 0x25f   : > { %v684_v42 = vpop.permute.xlu0 %683 }
 0x260   : > { %v686_v43 = vmul.f32 %v684_v42, %v681_v41  ;;  %v711_v44 = vsel %vm701_vm4, %v684_v42, 0.0 }
 0x261   : > { %712 = vadd.xlane.f32.xlu0 %v711_v44 }
 0x262   : > { %688 = vrot.lane.b32.xlu1 %v686_v43, %s1214_s25 }
 0x266   : > { %693 = vrot.lane.b32.xlu1 %v1017_v40, %s1215_s16 }
 0x2d4   : > { %v689_v48 = vpop.permute.xlu1 %688 }
 0x2d5   : > { %v691_v49 = vadd.f32 %v689_v48, %v680_v47 }
 0x2d7   : > { %1020 = vtanh.f32 %v691_v49 }
 0x2d8   : > { %v694_v51 = vpop.permute.xlu1 %693 }
 0x2e4   : > { %v1021_v50 = vpop.eup %1020 }
 0x2e5   : > { %v696_v52 = vmul.f32 %v1021_v50, %v694_v51 }
 0x2e7   : > { %698 = vrot.lane.b32.xlu1 %v696_v52, %s1215_s16 }
 0x2ea   : > { %v713_v53 = vpop.xlane.xlu0 %712 }
 0x2eb   : > { %v714_v54 = vrot.slane %v713_v53, 4  ;;  %704 = vrot.lane.b32.xlu1 %v691_v49, %s1215_s16 }
 0x2ed   : > { %v715_v55 = vadd.f32 %v714_v54, %v713_v53 }
 0x2ef   : > { %v716_v56 = vrot.slane %v715_v55, 2 }
 0x2f1   : > { %v717_v57 = vadd.f32 %v716_v56, %v715_v55 }
 0x2f3   : > { %v718_v58 = vrot.slane %v717_v57, 1 }
 0x2f5   : > { %v719_v59 = vadd.f32 %v718_v58, %v717_v57 }
 0x2f7   : > { %926 = vpush %v719_v59 }
 0x328   : > { %s927_s17 = spop %926 }
 0x329   : > { %v721_v61 = vstv %s927_s17 }
 0x359   : > { %v699_v60 = vpop.permute.xlu1 %698 }
 0x35a   : > { %702 = vst.msk [vmem:[#allocation2] sm:$0x3] %vm701_vm4, %v699_v60  ;;  %708 = vst.msk [vmem:[%s1440_s19] sm:$0x3] %vm701_vm4, %v699_v60 }
 0x35b   : > { %710 = vst.msk [vmem:[%s1440_s19] sm:$0x3] %vm709_vm5, %v691_v49 }
 0x35c   : > { %723 = vst.msk [vmem:[%s1440_s19] sm:$0x3] %vm722_vm6, %v721_v61 }
 0x35d   : > { %v705_v62 = vpop.permute.xlu1 %704 }
 0x35e   : > { %707 = vst.msk [vmem:[#allocation3] sm:$0x3] %vm701_vm4, %v705_v62 }
 0x35f PF: > { %p22_p13 = scmp.ge.s32.totalorder %s1332_s15, 10   ;;  %s1509_s27 = smov %s1194_s28 }
 0x360   : > { %s1510_s28 = smov %s1198_s29  ;;  %s1511_s29 = smov %s1342_s14 }
 0x361   : > { %s1512_s30 = smov %s1332_s15  ;;  %24 = sbr.rel (!%p22_p13) target bundleno = 9 (0x9), region = 121 }
 0x366   :  { %743 = vsyncpa [#allocation5], 1 }
 0x367   :  { %745 = vsyncpa [#allocation5 + $0x1], 1 }
 0x368   :  { %746 = vsyncpa [#allocation7], 1 }
 0x369   :  { %748 = vsyncpa [#allocation7 + $0x1], 1 }
 0x36a   :  { %749 = vsyncpa [#allocation10], 1 }

</bundles_post_ra>
